<compile_context>
chip_gen: v6e
topology: v6e:2x2x1
jax: 0.10.0
libtpu: 0.0.40
codegen_flags: <defaults>
</compile_context>

<pallas_src>
import functools

import numpy as np
import jax
import jax.numpy as jnp
from jax.experimental import pallas as pl
from jax.experimental.pallas import tpu as pltpu

NUM_LAYERS = 5
KERNEL_SIZE = 2   # dilation = 1
COUT_PAD = 128    # lane-dense output width


def _round_up(x, m):
    return ((x + m - 1) // m) * m


def tcn_kernel(x_ref, w0_ref, b0_ref, wmid_ref, bmid_ref, wout_ref, bout_ref, o_ref,
               *, seq_len):
    BT, LP, cin = x_ref.shape
    M = BT * LP
    cop = o_ref.shape[-1]

    # (BT, LP, Cin) -> (M, Cin). Rows [seq_len, LP) of each per-sample window are zero
    # (padded on the host), which is what makes the roll-based shift exact.
    h = x_ref[...].reshape(M, cin)

    # Row index within each sample's LP window (used to mask the invalid padding rows).
    row = jax.lax.broadcasted_iota(jnp.int32, (BT, LP, 1), 1).reshape(M, 1)

    def conv_k2(h_f32, w_taps, b, new_len):
        """Conv1d(k=2, pad=1): out[t] = w_tap0 @ h[t-1] + w_tap1 @ h[t], t in [0, new_len)."""
        hb = h_f32.astype(w_taps.dtype)
        p0 = jnp.dot(hb, w_taps[0], preferred_element_type=jnp.float32)
        p1 = jnp.dot(hb, w_taps[1], preferred_element_type=jnp.float32)
        # Shift p0 down by one row. The row rolled into each sample's position 0 is the
        # (always-zero) last row of the previous sample window, so there is no bleed.
        out = pltpu.roll(p0, shift=1, axis=0) + p1 + b
        # Bias + ReLU in f32, then zero the rows past the (static) new valid length so the
        # buffer invariant (trailing rows are zero) holds for the next layer.
        return jnp.where(row < new_len, jnp.maximum(out, 0.0), 0.0)

    # Layer 0: Conv1d(Cin -> Cnum) + ReLU
    h = conv_k2(h, w0_ref[...], b0_ref[...], seq_len + 1)
    # TODO(synk): Dropout is the identity here (inference semantics); no RNG masking.

    # Layers 1..4: Conv1d(Cnum -> Cnum) + ReLU (statically unrolled; valid length +1 per layer)
    for i in range(NUM_LAYERS - 1):
        h = conv_k2(h, wmid_ref[i], bmid_ref[i][None, :], seq_len + i + 2)

    # Output layer: 1x1 conv == dense over channels, lane-dense (Cout zero-padded to 128).
    o = (jnp.dot(h.astype(wout_ref.dtype), wout_ref[...],
                 preferred_element_type=jnp.float32)
         + bout_ref[...])
    o_ref[...] = o.reshape(BT, LP, cop)


def tcn_forward(x_nlc, kern_params, cout):
    """x_nlc: (N, L, Cin) float32 -> (N, L + NUM_LAYERS, cout) float32."""
    w0, b0, wmid, bmid, wout_p, bout_p = kern_params
    N, L, Cin = x_nlc.shape
    cop = wout_p.shape[1]
    Lout = L + NUM_LAYERS
    # Fixed 8-aligned time buffer; >= L + NUM_LAYERS + 1 keeps >=1 trailing zero row per
    # sample window at every layer (needed for the roll-based shift).
    LP = _round_up(L + NUM_LAYERS + 1, 8)

    # Batch several samples per grid step so the matmul M dimension is B_TILE * LP.
    B_TILE = min(8, N)
    N_pad = _round_up(N, B_TILE)

    # Host-side zero pad: samples -> N_pad, time -> LP (valid data at rows [0, L)).
    x_pad = jnp.pad(x_nlc, ((0, N_pad - N), (0, LP - L), (0, 0)))

    def full(shape):
        return pl.BlockSpec(shape, lambda i, _n=len(shape): (0,) * _n)

    out = pl.pallas_call(
        functools.partial(tcn_kernel, seq_len=L),
        out_shape=jax.ShapeDtypeStruct((N_pad, LP, cop), jnp.float32),
        grid_spec=pltpu.PrefetchScalarGridSpec(
            num_scalar_prefetch=0,
            grid=(N_pad // B_TILE,),
            in_specs=[
                pl.BlockSpec((B_TILE, LP, Cin), lambda i: (i, 0, 0)),  # batched activations
                full(w0.shape),      # (2, Cin, Cnum)        bf16
                full(b0.shape),      # (1, Cnum)             f32
                full(wmid.shape),    # (NUM_LAYERS-1, 2, Cnum, Cnum) bf16
                full(bmid.shape),    # (NUM_LAYERS-1, Cnum)  f32
                full(wout_p.shape),  # (Cnum, 128)           bf16 (zero-padded cols)
                full(bout_p.shape),  # (1, 128)              f32  (zero-padded cols)
            ],
            out_specs=pl.BlockSpec((B_TILE, LP, cop), lambda i: (i, 0, 0)),
        ),
        compiler_params=pltpu.CompilerParams(dimension_semantics=("parallel",)),
    )(x_pad, w0, b0, wmid, bmid, wout_p, bout_p)

    # Un-pad: drop padded samples, padded time rows and padded output channels.
    return out[:N, :Lout, :cout]


def init_params(key, cin, cnum, cout):
    """Deterministic PyTorch-style (uniform +-1/sqrt(fan_in*k)) init."""
    keys = jax.random.split(key, 2 * NUM_LAYERS + 2)
    convs = []
    for i in range(NUM_LAYERS):
        ic = cin if i == 0 else cnum
        bound = 1.0 / float(np.sqrt(ic * KERNEL_SIZE))
        w = jax.random.uniform(keys[2 * i], (cnum, ic, KERNEL_SIZE), jnp.float32, -bound, bound)
        b = jax.random.uniform(keys[2 * i + 1], (cnum,), jnp.float32, -bound, bound)
        convs.append((w, b))
    bound = 1.0 / float(np.sqrt(cnum))
    wout_pt = jax.random.uniform(keys[-2], (cout, cnum, 1), jnp.float32, -bound, bound)
    bout_pt = jax.random.uniform(keys[-1], (cout,), jnp.float32, -bound, bound)

    # Repack for the kernel: PyTorch (O, I, K) -> tap-major (K, I, O); bf16 for the MXU dots.
    w0 = jnp.transpose(convs[0][0], (2, 1, 0)).astype(jnp.bfloat16)        # (2, Cin, Cnum)
    b0 = convs[0][1][None, :]                                              # (1, Cnum) f32
    wmid = jnp.stack([jnp.transpose(convs[i][0], (2, 1, 0))
                      for i in range(1, NUM_LAYERS)]).astype(jnp.bfloat16)  # (4, 2, Cnum, Cnum)
    bmid = jnp.stack([convs[i][1] for i in range(1, NUM_LAYERS)])          # (4, Cnum) f32

    # Lane-dense output head: zero-pad Cout -> 128 (exact: padded cols/bias are zero).
    wout = wout_pt[:, :, 0].T                                              # (Cnum, Cout)
    wout_p = (jnp.zeros((cnum, COUT_PAD), jnp.float32)
              .at[:, :cout].set(wout).astype(jnp.bfloat16))                # (Cnum, 128)
    bout_p = jnp.zeros((1, COUT_PAD), jnp.float32).at[:, :cout].set(bout_pt[None, :])

    pt_params = (convs, wout_pt, bout_pt)
    kern_params = (w0, b0, wmid, bmid, wout_p, bout_p)
    return pt_params, kern_params


def reference_forward(x_ncw, pt_params):
    """Pure-JAX f32 reference with PyTorch Conv1d semantics (NCW)."""
    convs, wout_pt, bout_pt = pt_params
    dn = ("NCH", "OIH", "NCH")
    h = x_ncw
    for w, b in convs:
        h = jax.lax.conv_general_dilated(h, w, (1,), [(1, 1)], dimension_numbers=dn)
        h = jnp.maximum(h + b[None, :, None], 0.0)
    o = jax.lax.conv_general_dilated(h, wout_pt, (1,), [(0, 0)], dimension_numbers=dn)
    return o + bout_pt[None, :, None]


if __name__ == "__main__":
    key = jax.random.PRNGKey(0)
    k_x, k_p = jax.random.split(key)

    N, Cin, L = 2, 4, 16      # batch, input_size, sequence length
    Cnum, Cout = 32, 3        # num_channels, output_size

    x_ncw = jax.random.normal(k_x, (N, Cin, L), jnp.float32)   # PyTorch NCW input
    pt_params, kern_params = init_params(k_p, Cin, Cnum, Cout)

    x_nlc = jnp.transpose(x_ncw, (0, 2, 1))                    # to kernel layout NLC
    out_nlc = tcn_forward(x_nlc, kern_params, Cout)
    out_ncw = jnp.transpose(out_nlc, (0, 2, 1))                # back to NCW: (N, Cout, L+5)
    jax.block_until_ready(out_ncw)

    ref = reference_forward(x_ncw, pt_params)
    # bf16 dot inputs with f32 accumulation -> looser tolerance vs. the f32 reference.
    np.testing.assert_allclose(np.asarray(out_ncw), np.asarray(ref), rtol=2e-2, atol=2e-2)
    print("KERNEL_OK")
</pallas_src>

<mosaic_0001>
module attributes {stable_mosaic.version = 11 : i64} {
  func.func @tcn_kernel(%arg0: i32, %arg1: memref<2x24x4xf32, #tpu.memory_space<vmem>>, %arg2: memref<2x4x32xbf16, #tpu.memory_space<vmem>>, %arg3: memref<1x32xf32, #tpu.memory_space<vmem>>, %arg4: memref<4x2x32x32xbf16, #tpu.memory_space<vmem>>, %arg5: memref<4x32xf32, #tpu.memory_space<vmem>>, %arg6: memref<32x128xbf16, #tpu.memory_space<vmem>>, %arg7: memref<1x128xf32, #tpu.memory_space<vmem>>, %arg8: memref<2x24x128xf32, #tpu.memory_space<vmem>>) attributes {dimension_semantics = [#tpu.dimension_semantics<parallel>], iteration_bounds = array<i64: 1>, scalar_prefetch = 0 : i64, scratch_operands = 0 : i64, tpu.core_type = #tpu.core_type<tc>, window_params = [{transform_indices = @transform_0, window_bounds = array<i64: 2, 24, 4>}, {pipeline_mode = #tpu.pipeline_mode<synchronous>, transform_indices = @transform_1, window_bounds = array<i64: 2, 4, 32>}, {pipeline_mode = #tpu.pipeline_mode<synchronous>, transform_indices = @transform_2, window_bounds = array<i64: 1, 32>}, {pipeline_mode = #tpu.pipeline_mode<synchronous>, transform_indices = @transform_3, window_bounds = array<i64: 4, 2, 32, 32>}, {pipeline_mode = #tpu.pipeline_mode<synchronous>, transform_indices = @transform_4, window_bounds = array<i64: 4, 32>}, {pipeline_mode = #tpu.pipeline_mode<synchronous>, transform_indices = @transform_5, window_bounds = array<i64: 32, 128>}, {pipeline_mode = #tpu.pipeline_mode<synchronous>, transform_indices = @transform_6, window_bounds = array<i64: 1, 128>}, {transform_indices = @transform_7, window_bounds = array<i64: 2, 24, 128>}]} {
    %c0 = arith.constant 0 : index
    %c0_0 = arith.constant 0 : index
    %c0_1 = arith.constant 0 : index
    %0 = vector.load %arg1[%c0, %c0_0, %c0_1] : memref<2x24x4xf32, #tpu.memory_space<vmem>>, vector<2x24x4xf32>
    %1 = vector.shape_cast %0 : vector<2x24x4xf32> to vector<48x4xf32>
    %2 = tpu.iota {dimensions = array<i32: 1>} : vector<2x24x1xi32>
    %3 = vector.shape_cast %2 : vector<2x24x1xi32> to vector<48x1xi32>
    %c0_2 = arith.constant 0 : index
    %c0_3 = arith.constant 0 : index
    %c0_4 = arith.constant 0 : index
    %4 = vector.load %arg2[%c0_2, %c0_3, %c0_4] : memref<2x4x32xbf16, #tpu.memory_space<vmem>>, vector<2x4x32xbf16>
    %c0_5 = arith.constant 0 : index
    %c0_6 = arith.constant 0 : index
    %5 = vector.load %arg3[%c0_5, %c0_6] : memref<1x32xf32, #tpu.memory_space<vmem>>, vector<1x32xf32>
    %6 = arith.truncf %1 : vector<48x4xf32> to vector<48x4xbf16>
    %7 = vector.extract_strided_slice %4 {offsets = [0, 0, 0], sizes = [1, 4, 32], strides = [1, 1, 1]} : vector<2x4x32xbf16> to vector<1x4x32xbf16>
    %8 = vector.shape_cast %7 : vector<1x4x32xbf16> to vector<4x32xbf16>
    %cst = arith.constant dense<0.000000e+00> : vector<48x32xf32>
    %9 = tpu.matmul %6, %8, %cst {dimension_numbers = #tpu.dot_dimension_numbers<[1], [0], [0], [1], [0, 0, 1, 1], [], []>} : vector<48x4xbf16>, vector<4x32xbf16>, vector<48x32xf32> -> vector<48x32xf32>
    %10 = vector.extract_strided_slice %4 {offsets = [1, 0, 0], sizes = [1, 4, 32], strides = [1, 1, 1]} : vector<2x4x32xbf16> to vector<1x4x32xbf16>
    %11 = vector.shape_cast %10 : vector<1x4x32xbf16> to vector<4x32xbf16>
    %cst_7 = arith.constant dense<0.000000e+00> : vector<48x32xf32>
    %12 = tpu.matmul %6, %11, %cst_7 {dimension_numbers = #tpu.dot_dimension_numbers<[1], [0], [0], [1], [0, 0, 1, 1], [], []>} : vector<48x4xbf16>, vector<4x32xbf16>, vector<48x32xf32> -> vector<48x32xf32>
    %c1_i32 = arith.constant 1 : i32
    %13 = tpu.dynamic_rotate %9 by %c1_i32 dim 0 : vector<48x32xf32>, i32 -> vector<48x32xf32>
    %14 = arith.addf %13, %12 : vector<48x32xf32>
    %15 = vector.broadcast %5 : vector<1x32xf32> to vector<48x32xf32>
    %16 = arith.addf %14, %15 : vector<48x32xf32>
    %c17_i32 = arith.constant 17 : i32
    %17 = vector.broadcast %c17_i32 : i32 to vector<48x1xi32>
    %18 = arith.cmpi slt, %3, %17 : vector<48x1xi32>
    %cst_8 = arith.constant 0.000000e+00 : f32
    %19 = vector.broadcast %cst_8 : f32 to vector<48x32xf32>
    %20 = arith.maximumf %16, %19 : vector<48x32xf32>
    %cst_9 = arith.constant 0.000000e+00 : f32
    %21 = vector.shape_cast %18 : vector<48x1xi1> to vector<48x1xi1>
    %22 = vector.broadcast %21 : vector<48x1xi1> to vector<48x32xi1>
    %23 = vector.broadcast %cst_9 : f32 to vector<48x32xf32>
    %24 = arith.select %22, %20, %23 : vector<48x32xi1>, vector<48x32xf32>
    %c0_10 = arith.constant 0 : index
    %c0_11 = arith.constant 0 : index
    %c0_12 = arith.constant 0 : index
    %c0_13 = arith.constant 0 : index
    %25 = vector.load %arg4[%c0_10, %c0_11, %c0_12, %c0_13] : memref<4x2x32x32xbf16, #tpu.memory_space<vmem>>, vector<1x2x32x32xbf16>
    %26 = vector.shape_cast %25 : vector<1x2x32x32xbf16> to vector<2x32x32xbf16>
    %c0_14 = arith.constant 0 : index
    %c0_15 = arith.constant 0 : index
    %27 = vector.load %arg5[%c0_14, %c0_15] : memref<4x32xf32, #tpu.memory_space<vmem>>, vector<1x32xf32>
    %28 = vector.shape_cast %27 : vector<1x32xf32> to vector<32xf32>
    %29 = vector.shape_cast %28 : vector<32xf32> to vector<1x32xf32>
    %30 = arith.truncf %24 : vector<48x32xf32> to vector<48x32xbf16>
    %31 = vector.extract_strided_slice %26 {offsets = [0, 0, 0], sizes = [1, 32, 32], strides = [1, 1, 1]} : vector<2x32x32xbf16> to vector<1x32x32xbf16>
    %32 = vector.shape_cast %31 : vector<1x32x32xbf16> to vector<32x32xbf16>
    %cst_16 = arith.constant dense<0.000000e+00> : vector<48x32xf32>
    %33 = tpu.matmul %30, %32, %cst_16 {dimension_numbers = #tpu.dot_dimension_numbers<[1], [0], [0], [1], [0, 0, 1, 1], [], []>} : vector<48x32xbf16>, vector<32x32xbf16>, vector<48x32xf32> -> vector<48x32xf32>
    %34 = vector.extract_strided_slice %26 {offsets = [1, 0, 0], sizes = [1, 32, 32], strides = [1, 1, 1]} : vector<2x32x32xbf16> to vector<1x32x32xbf16>
    %35 = vector.shape_cast %34 : vector<1x32x32xbf16> to vector<32x32xbf16>
    %cst_17 = arith.constant dense<0.000000e+00> : vector<48x32xf32>
    %36 = tpu.matmul %30, %35, %cst_17 {dimension_numbers = #tpu.dot_dimension_numbers<[1], [0], [0], [1], [0, 0, 1, 1], [], []>} : vector<48x32xbf16>, vector<32x32xbf16>, vector<48x32xf32> -> vector<48x32xf32>
    %c1_i32_18 = arith.constant 1 : i32
    %37 = tpu.dynamic_rotate %33 by %c1_i32_18 dim 0 : vector<48x32xf32>, i32 -> vector<48x32xf32>
    %38 = arith.addf %37, %36 : vector<48x32xf32>
    %39 = vector.broadcast %29 : vector<1x32xf32> to vector<48x32xf32>
    %40 = arith.addf %38, %39 : vector<48x32xf32>
    %c18_i32 = arith.constant 18 : i32
    %41 = vector.broadcast %c18_i32 : i32 to vector<48x1xi32>
    %42 = arith.cmpi slt, %3, %41 : vector<48x1xi32>
    %cst_19 = arith.constant 0.000000e+00 : f32
    %43 = vector.broadcast %cst_19 : f32 to vector<48x32xf32>
    %44 = arith.maximumf %40, %43 : vector<48x32xf32>
    %cst_20 = arith.constant 0.000000e+00 : f32
    %45 = vector.shape_cast %42 : vector<48x1xi1> to vector<48x1xi1>
    %46 = vector.broadcast %45 : vector<48x1xi1> to vector<48x32xi1>
    %47 = vector.broadcast %cst_20 : f32 to vector<48x32xf32>
    %48 = arith.select %46, %44, %47 : vector<48x32xi1>, vector<48x32xf32>
    %c1 = arith.constant 1 : index
    %c0_21 = arith.constant 0 : index
    %c0_22 = arith.constant 0 : index
    %c0_23 = arith.constant 0 : index
    %49 = vector.load %arg4[%c1, %c0_21, %c0_22, %c0_23] : memref<4x2x32x32xbf16, #tpu.memory_space<vmem>>, vector<1x2x32x32xbf16>
    %50 = vector.shape_cast %49 : vector<1x2x32x32xbf16> to vector<2x32x32xbf16>
    %c1_24 = arith.constant 1 : index
    %c0_25 = arith.constant 0 : index
    %51 = vector.load %arg5[%c1_24, %c0_25] : memref<4x32xf32, #tpu.memory_space<vmem>>, vector<1x32xf32>
    %52 = vector.shape_cast %51 : vector<1x32xf32> to vector<32xf32>
    %53 = vector.shape_cast %52 : vector<32xf32> to vector<1x32xf32>
    %54 = arith.truncf %48 : vector<48x32xf32> to vector<48x32xbf16>
    %55 = vector.extract_strided_slice %50 {offsets = [0, 0, 0], sizes = [1, 32, 32], strides = [1, 1, 1]} : vector<2x32x32xbf16> to vector<1x32x32xbf16>
    %56 = vector.shape_cast %55 : vector<1x32x32xbf16> to vector<32x32xbf16>
    %cst_26 = arith.constant dense<0.000000e+00> : vector<48x32xf32>
    %57 = tpu.matmul %54, %56, %cst_26 {dimension_numbers = #tpu.dot_dimension_numbers<[1], [0], [0], [1], [0, 0, 1, 1], [], []>} : vector<48x32xbf16>, vector<32x32xbf16>, vector<48x32xf32> -> vector<48x32xf32>
    %58 = vector.extract_strided_slice %50 {offsets = [1, 0, 0], sizes = [1, 32, 32], strides = [1, 1, 1]} : vector<2x32x32xbf16> to vector<1x32x32xbf16>
    %59 = vector.shape_cast %58 : vector<1x32x32xbf16> to vector<32x32xbf16>
    %cst_27 = arith.constant dense<0.000000e+00> : vector<48x32xf32>
    %60 = tpu.matmul %54, %59, %cst_27 {dimension_numbers = #tpu.dot_dimension_numbers<[1], [0], [0], [1], [0, 0, 1, 1], [], []>} : vector<48x32xbf16>, vector<32x32xbf16>, vector<48x32xf32> -> vector<48x32xf32>
    %c1_i32_28 = arith.constant 1 : i32
    %61 = tpu.dynamic_rotate %57 by %c1_i32_28 dim 0 : vector<48x32xf32>, i32 -> vector<48x32xf32>
    %62 = arith.addf %61, %60 : vector<48x32xf32>
    %63 = vector.broadcast %53 : vector<1x32xf32> to vector<48x32xf32>
    %64 = arith.addf %62, %63 : vector<48x32xf32>
    %c19_i32 = arith.constant 19 : i32
    %65 = vector.broadcast %c19_i32 : i32 to vector<48x1xi32>
    %66 = arith.cmpi slt, %3, %65 : vector<48x1xi32>
    %cst_29 = arith.constant 0.000000e+00 : f32
    %67 = vector.broadcast %cst_29 : f32 to vector<48x32xf32>
    %68 = arith.maximumf %64, %67 : vector<48x32xf32>
    %cst_30 = arith.constant 0.000000e+00 : f32
    %69 = vector.shape_cast %66 : vector<48x1xi1> to vector<48x1xi1>
    %70 = vector.broadcast %69 : vector<48x1xi1> to vector<48x32xi1>
    %71 = vector.broadcast %cst_30 : f32 to vector<48x32xf32>
    %72 = arith.select %70, %68, %71 : vector<48x32xi1>, vector<48x32xf32>
    %c2 = arith.constant 2 : index
    %c0_31 = arith.constant 0 : index
    %c0_32 = arith.constant 0 : index
    %c0_33 = arith.constant 0 : index
    %73 = vector.load %arg4[%c2, %c0_31, %c0_32, %c0_33] : memref<4x2x32x32xbf16, #tpu.memory_space<vmem>>, vector<1x2x32x32xbf16>
    %74 = vector.shape_cast %73 : vector<1x2x32x32xbf16> to vector<2x32x32xbf16>
    %c2_34 = arith.constant 2 : index
    %c0_35 = arith.constant 0 : index
    %75 = vector.load %arg5[%c2_34, %c0_35] : memref<4x32xf32, #tpu.memory_space<vmem>>, vector<1x32xf32>
    %76 = vector.shape_cast %75 : vector<1x32xf32> to vector<32xf32>
    %77 = vector.shape_cast %76 : vector<32xf32> to vector<1x32xf32>
    %78 = arith.truncf %72 : vector<48x32xf32> to vector<48x32xbf16>
    %79 = vector.extract_strided_slice %74 {offsets = [0, 0, 0], sizes = [1, 32, 32], strides = [1, 1, 1]} : vector<2x32x32xbf16> to vector<1x32x32xbf16>
    %80 = vector.shape_cast %79 : vector<1x32x32xbf16> to vector<32x32xbf16>
    %cst_36 = arith.constant dense<0.000000e+00> : vector<48x32xf32>
    %81 = tpu.matmul %78, %80, %cst_36 {dimension_numbers = #tpu.dot_dimension_numbers<[1], [0], [0], [1], [0, 0, 1, 1], [], []>} : vector<48x32xbf16>, vector<32x32xbf16>, vector<48x32xf32> -> vector<48x32xf32>
    %82 = vector.extract_strided_slice %74 {offsets = [1, 0, 0], sizes = [1, 32, 32], strides = [1, 1, 1]} : vector<2x32x32xbf16> to vector<1x32x32xbf16>
    %83 = vector.shape_cast %82 : vector<1x32x32xbf16> to vector<32x32xbf16>
    %cst_37 = arith.constant dense<0.000000e+00> : vector<48x32xf32>
    %84 = tpu.matmul %78, %83, %cst_37 {dimension_numbers = #tpu.dot_dimension_numbers<[1], [0], [0], [1], [0, 0, 1, 1], [], []>} : vector<48x32xbf16>, vector<32x32xbf16>, vector<48x32xf32> -> vector<48x32xf32>
    %c1_i32_38 = arith.constant 1 : i32
    %85 = tpu.dynamic_rotate %81 by %c1_i32_38 dim 0 : vector<48x32xf32>, i32 -> vector<48x32xf32>
    %86 = arith.addf %85, %84 : vector<48x32xf32>
    %87 = vector.broadcast %77 : vector<1x32xf32> to vector<48x32xf32>
    %88 = arith.addf %86, %87 : vector<48x32xf32>
    %c20_i32 = arith.constant 20 : i32
    %89 = vector.broadcast %c20_i32 : i32 to vector<48x1xi32>
    %90 = arith.cmpi slt, %3, %89 : vector<48x1xi32>
    %cst_39 = arith.constant 0.000000e+00 : f32
    %91 = vector.broadcast %cst_39 : f32 to vector<48x32xf32>
    %92 = arith.maximumf %88, %91 : vector<48x32xf32>
    %cst_40 = arith.constant 0.000000e+00 : f32
    %93 = vector.shape_cast %90 : vector<48x1xi1> to vector<48x1xi1>
    %94 = vector.broadcast %93 : vector<48x1xi1> to vector<48x32xi1>
    %95 = vector.broadcast %cst_40 : f32 to vector<48x32xf32>
    %96 = arith.select %94, %92, %95 : vector<48x32xi1>, vector<48x32xf32>
    %c3 = arith.constant 3 : index
    %c0_41 = arith.constant 0 : index
    %c0_42 = arith.constant 0 : index
    %c0_43 = arith.constant 0 : index
    %97 = vector.load %arg4[%c3, %c0_41, %c0_42, %c0_43] : memref<4x2x32x32xbf16, #tpu.memory_space<vmem>>, vector<1x2x32x32xbf16>
    %98 = vector.shape_cast %97 : vector<1x2x32x32xbf16> to vector<2x32x32xbf16>
    %c3_44 = arith.constant 3 : index
    %c0_45 = arith.constant 0 : index
    %99 = vector.load %arg5[%c3_44, %c0_45] : memref<4x32xf32, #tpu.memory_space<vmem>>, vector<1x32xf32>
    %100 = vector.shape_cast %99 : vector<1x32xf32> to vector<32xf32>
    %101 = vector.shape_cast %100 : vector<32xf32> to vector<1x32xf32>
    %102 = arith.truncf %96 : vector<48x32xf32> to vector<48x32xbf16>
    %103 = vector.extract_strided_slice %98 {offsets = [0, 0, 0], sizes = [1, 32, 32], strides = [1, 1, 1]} : vector<2x32x32xbf16> to vector<1x32x32xbf16>
    %104 = vector.shape_cast %103 : vector<1x32x32xbf16> to vector<32x32xbf16>
    %cst_46 = arith.constant dense<0.000000e+00> : vector<48x32xf32>
    %105 = tpu.matmul %102, %104, %cst_46 {dimension_numbers = #tpu.dot_dimension_numbers<[1], [0], [0], [1], [0, 0, 1, 1], [], []>} : vector<48x32xbf16>, vector<32x32xbf16>, vector<48x32xf32> -> vector<48x32xf32>
    %106 = vector.extract_strided_slice %98 {offsets = [1, 0, 0], sizes = [1, 32, 32], strides = [1, 1, 1]} : vector<2x32x32xbf16> to vector<1x32x32xbf16>
    %107 = vector.shape_cast %106 : vector<1x32x32xbf16> to vector<32x32xbf16>
    %cst_47 = arith.constant dense<0.000000e+00> : vector<48x32xf32>
    %108 = tpu.matmul %102, %107, %cst_47 {dimension_numbers = #tpu.dot_dimension_numbers<[1], [0], [0], [1], [0, 0, 1, 1], [], []>} : vector<48x32xbf16>, vector<32x32xbf16>, vector<48x32xf32> -> vector<48x32xf32>
    %c1_i32_48 = arith.constant 1 : i32
    %109 = tpu.dynamic_rotate %105 by %c1_i32_48 dim 0 : vector<48x32xf32>, i32 -> vector<48x32xf32>
    %110 = arith.addf %109, %108 : vector<48x32xf32>
    %111 = vector.broadcast %101 : vector<1x32xf32> to vector<48x32xf32>
    %112 = arith.addf %110, %111 : vector<48x32xf32>
    %c21_i32 = arith.constant 21 : i32
    %113 = vector.broadcast %c21_i32 : i32 to vector<48x1xi32>
    %114 = arith.cmpi slt, %3, %113 : vector<48x1xi32>
    %cst_49 = arith.constant 0.000000e+00 : f32
    %115 = vector.broadcast %cst_49 : f32 to vector<48x32xf32>
    %116 = arith.maximumf %112, %115 : vector<48x32xf32>
    %cst_50 = arith.constant 0.000000e+00 : f32
    %117 = vector.shape_cast %114 : vector<48x1xi1> to vector<48x1xi1>
    %118 = vector.broadcast %117 : vector<48x1xi1> to vector<48x32xi1>
    %119 = vector.broadcast %cst_50 : f32 to vector<48x32xf32>
    %120 = arith.select %118, %116, %119 : vector<48x32xi1>, vector<48x32xf32>
    %121 = arith.truncf %120 : vector<48x32xf32> to vector<48x32xbf16>
    %c0_51 = arith.constant 0 : index
    %c0_52 = arith.constant 0 : index
    %122 = vector.load %arg6[%c0_51, %c0_52] : memref<32x128xbf16, #tpu.memory_space<vmem>>, vector<32x128xbf16>
    %cst_53 = arith.constant dense<0.000000e+00> : vector<48x128xf32>
    %123 = tpu.matmul %121, %122, %cst_53 {dimension_numbers = #tpu.dot_dimension_numbers<[1], [0], [0], [1], [0, 0, 1, 1], [], []>} : vector<48x32xbf16>, vector<32x128xbf16>, vector<48x128xf32> -> vector<48x128xf32>
    %c0_54 = arith.constant 0 : index
    %c0_55 = arith.constant 0 : index
    %124 = vector.load %arg7[%c0_54, %c0_55] : memref<1x128xf32, #tpu.memory_space<vmem>>, vector<1x128xf32>
    %125 = vector.broadcast %124 : vector<1x128xf32> to vector<48x128xf32>
    %126 = arith.addf %123, %125 : vector<48x128xf32>
    %127 = vector.shape_cast %126 : vector<48x128xf32> to vector<2x24x128xf32>
    %c0_56 = arith.constant 0 : index
    %c0_57 = arith.constant 0 : index
    %c0_58 = arith.constant 0 : index
    %128 = vector.load %arg8[%c0_56, %c0_57, %c0_58] : memref<2x24x128xf32, #tpu.memory_space<vmem>>, vector<2x24x128xf32>
    tpu.vector_store %arg8[%c0_56, %c0_57, %c0_58], %127 {strides = array<i32>} : memref<2x24x128xf32, #tpu.memory_space<vmem>>, vector<2x24x128xf32>,
    return
  }
  func.func @transform_0(%arg0: i32) -> (i32, i32, i32) {
    %c0_i32 = arith.constant 0 : i32
    %c0_i32_0 = arith.constant 0 : i32
    %c0_i32_1 = arith.constant 0 : i32
    return %arg0, %c0_i32, %c0_i32_0 : i32, i32, i32
  }
  func.func @transform_1(%arg0: i32) -> (i32, i32, i32) {
    %c0_i32 = arith.constant 0 : i32
    %c0_i32_0 = arith.constant 0 : i32
    %c0_i32_1 = arith.constant 0 : i32
    %c0_i32_2 = arith.constant 0 : i32
    return %c0_i32, %c0_i32_0, %c0_i32_1 : i32, i32, i32
  }
  func.func @transform_2(%arg0: i32) -> (i32, i32) {
    %c0_i32 = arith.constant 0 : i32
    %c0_i32_0 = arith.constant 0 : i32
    %c0_i32_1 = arith.constant 0 : i32
    return %c0_i32, %c0_i32_0 : i32, i32
  }
  func.func @transform_3(%arg0: i32) -> (i32, i32, i32, i32) {
    %c0_i32 = arith.constant 0 : i32
    %c0_i32_0 = arith.constant 0 : i32
    %c0_i32_1 = arith.constant 0 : i32
    %c0_i32_2 = arith.constant 0 : i32
    %c0_i32_3 = arith.constant 0 : i32
    return %c0_i32, %c0_i32_0, %c0_i32_1, %c0_i32_2 : i32, i32, i32, i32
  }
  func.func @transform_4(%arg0: i32) -> (i32, i32) {
    %c0_i32 = arith.constant 0 : i32
    %c0_i32_0 = arith.constant 0 : i32
    %c0_i32_1 = arith.constant 0 : i32
    return %c0_i32, %c0_i32_0 : i32, i32
  }
  func.func @transform_5(%arg0: i32) -> (i32, i32) {
    %c0_i32 = arith.constant 0 : i32
    %c0_i32_0 = arith.constant 0 : i32
    %c0_i32_1 = arith.constant 0 : i32
    return %c0_i32, %c0_i32_0 : i32, i32
  }
  func.func @transform_6(%arg0: i32) -> (i32, i32) {
    %c0_i32 = arith.constant 0 : i32
    %c0_i32_0 = arith.constant 0 : i32
    %c0_i32_1 = arith.constant 0 : i32
    return %c0_i32, %c0_i32_0 : i32, i32
  }
  func.func @transform_7(%arg0: i32) -> (i32, i32, i32) {
    %c0_i32 = arith.constant 0 : i32
    %c0_i32_0 = arith.constant 0 : i32
    %c0_i32_1 = arith.constant 0 : i32
    return %arg0, %c0_i32, %c0_i32_0 : i32, i32, i32
  }
}

</mosaic_0001>

<bundles_post_ra>
// kernel: tpu_custom_call.1
= control target key start
LH: loop header
LB: loop body
LE: loop exit
PB: predicated region body
PF: predicated region fallthrough
CT: control target
= control target key end

     0   :  { %12 = vsyncpa [#allocation3], 0  ;;  %s1843_s0 = inlined_call_operand.vmem [shape: f32[2,24,4], index: 0, kind: input, shape index: {}]   ;;  %s1844_s1 = inlined_call_operand.vmem [shape: bf16[2,4,32], index: 1, kind: input, shape index: {}]   ;;  %s1845_s2 = inlined_call_operand.vmem [shape: f32[1,32], index: 2, kind: input, shape index: {}]   ;;  %s1846_s3 = inlined_call_operand.hbm [shape: bf16[4,2,32,32], index: 3, kind: input, shape index: {}]   ;;  %s1847_s4 = inlined_call_operand.vmem [shape: f32[4,32], index: 4, kind: input, shape index: {}]   ;;  %s1848_s5 = inlined_call_operand.vmem [shape: bf16[32,128], index: 5, kind: input, shape index: {}]   ;;  %s1849_s6 = inlined_call_operand.vmem [shape: f32[1,128], index: 6, kind: input, shape index: {}]   ;;  %s1850_s7 = inlined_call_operand.hbm [shape: f32[2,24,128], index: 7, kind: output, shape index: {}]  }
   0x1   :  { %13 = vsyncpa [#allocation4], 0  ;;  %s1546_s24 = smov [#allocation2]  }
   0x2   :  { %s25_s25 = sshll.u32 %s1546_s24, 4  ;;  %s26_s25 = int_to_ptr.vmem [resolvable:$true] %s25_s25 }
   0x3   :  { %s1510_s26 = scalar_lea.vmem %s26_s25, 2048  ;;  %p1515_p1 = scmp.lt.s32.totalorder %s26_s25, %s26_s25 }
   0x4   :  { %p1511_p0 = scmp.ne.s32.totalorder %s26_s25, %s1510_s26  ;;  %p1516_p2 = scmp.lt.s32.totalorder %s1510_s26, %s1510_s26 }
   0x6   :  { %p1517_p3 = por %p1516_p2, %p1515_p1 }
   0x8   :  { %p1518_p4 = pnand %p1517_p3, %p1511_p0 }
   0xa   :  { %1521 = shalt.err (!%p1518_p4)
}
   0xb   :  { %s1547_s27 = smov 64   ;;  %s1548_s28 = smov 4  }
   0xc   :  { %31 = dma.hbm_to_vmem [thread:$0]  %s1846_s3, 2048, %s26_s25, [#allocation3], %s1547_s27, %s1547_s27, %s1548_s28  }
   0xd   :  { %1542 = dma.done.wait [#allocation3], 2048  }
   0xe   :  { %1543 = vsyncadd [#allocation3], 4294965248  ;;  %v1549_v0 = vmov 0.0   ;;  %vm1550_vm0 = vmmov 0   ;;  %vm68_vm1 = vcmask 1041408   ;;  %v42_v3 = vld [vmem:[%s1843_s0] sm:$0xff]  ;;  %v48_v26 = vlaneseq }
   0xf   :  { %1302 = vmatprep.subr.bf16.mxu0 %v1549_v0  ;;  %1474 = vmatprep.subr.bf16.mxu1 %v1549_v0  ;;  %v52_v1 = vld [vmem:[%s1844_s1] sm:$0x3]  ;;  %v53_v2 = vld [vmem:[%s1844_s1 + $0x2] sm:$0x3]  ;;  %v43_v5 = vld [vmem:[%s1843_s0 + $0x8] sm:$0xff]  ;;  %vm58_vm2 = vcmask 31744  }
  0x10   :  { %1304 = vmatprep.mubr.msk.bf16.mxu0 %vm1550_vm0, %v1549_v0  ;;  %1308 = vmatprep.mubr.msk.bf16.mxu1 %vm1550_vm0, %v1549_v0  ;;  %v70_v4 = vsel %vm68_vm1, %v52_v1, 0  ;;  %v44_v6 = vld [vmem:[%s1843_s0 + $0x10] sm:$0xff]  ;;  %v45_v7 = vld [vmem:[%s1843_s0 + $0x18] sm:$0xff]  ;;  %v130_v8 = vsel %vm68_vm1, %v53_v2, 0  ;;  %v55_v9 = vpack.c.bf16 %v43_v5, %v42_v3  ;;  %v46_v11 = vld [vmem:[%s1843_s0 + $0x20] sm:$0xff]  ;;  %v1652_v29 = vshrl.u32 %v48_v26, 7 }
  0x11   :  { %1303 = vmatpush3.bf16.msra.mxu0 %v70_v4  ;;  %1475 = vmatpush3.bf16.msra.mxu1 %v70_v4  ;;  %v56_v10 = vpack.c.bf16 %v45_v7, %v44_v6  ;;  %v47_v12 = vld [vmem:[%s1843_s0 + $0x28] sm:$0xff]  ;;  %v1485_v15 = vld [vmem:[#allocation2 + $0x18] sm:$0xff]   ;;  %v1486_v16 = vld [vmem:[#allocation2] sm:$0xff]   ;;  %vm265_vm4 = vcmask 261120   ;;  %s1551_s10 = smov [#allocation5]  }
  0x12   :  { %1316 = vmatprep.subr.bf16.mxu1 %v1549_v0  ;;  %1330 = vmatprep.subr.bf16.mxu0 %v1549_v0  ;;  %v57_v13 = vpack.c.bf16 %v47_v12, %v46_v11  ;;  %v1484_v14 = vld [vmem:[#allocation2 + $0x8] sm:$0xff]   ;;  %v1487_v17 = vld [vmem:[#allocation2 + $0x10] sm:$0xff]   ;;  %vm195_vm3 = vcmp.lt.s32.totalorder %v1652_v29, 1  ;;  %v1198_v38 = vld [vmem:[%s1845_s2] ss:$0 sm:$0xff]  ;;  %v1665_v55 = vadd.s32 16, %v1652_v29 }
  0x14   :  { %1305 = vmatmul.mubr.msk.bf16.vlgmr.msra.gmra.mxu0 %vm58_vm2, %v55_v9  ;;  %1309 = vmatmul.mubr.msk.bf16.vlgmr.msra.gmra.mxu1 %vm58_vm2, %v56_v10  ;;  %vm222_vm5 = vcmp.lt.s32.totalorder %v1665_v55, 17  ;;  %vm431_vm6 = vcmp.lt.s32.totalorder %v1665_v55, 18  ;;  %vm640_vm7 = vcmp.lt.s32.totalorder %v1665_v55, 19  ;;  %vm849_vm8 = vcmp.lt.s32.totalorder %v1665_v55, 20 }
  0x15   :  { %1317 = vmatpush3.bf16.msra.mxu1 %v130_v8  ;;  %1312 = vmatprep.mubr.msk.bf16.mxu1 %vm1550_vm0, %v1549_v0  ;;  %vm1058_vm9 = vcmp.lt.s32.totalorder %v1665_v55, 21  ;;  %v1243_v55 = vld [vmem:[%s1849_s6] ss:$0 sm:$0xff]  ;;  %s1180_s6 = sshll.u32 %s1551_s10, 4  ;;  %s1181_s6 = int_to_ptr.vmem [resolvable:$true] %s1180_s6 }
  0x16   :  { %1346 = vmatprep.subr.bf16.mxu1 %v1549_v0  ;;  %1334 = vmatprep.mubr.msk.bf16.mxu0 %vm1550_vm0, %v1549_v0  ;;  %s1522_s11 = scalar_lea.vmem %s1181_s6, 768  ;;  %p1527_p6 = scmp.lt.s32.totalorder %s1181_s6, %s1181_s6 }
  0x17   :  { %1331 = vmatpush3.bf16.msra.mxu0 %v1484_v14  ;;  %p1523_p5 = scmp.ne.s32.totalorder %s1181_s6, %s1522_s11  ;;  %p1528_p7 = scmp.lt.s32.totalorder %s1522_s11, %s1522_s11 }
  0x18   :  { %1332 = vmatprep.subr.bf16.mxu0 %v1549_v0 }
  0x19   :  { %p1529_p8 = por %p1528_p7, %p1527_p6 }
  0x1b   :  { %1333 = vmatpush3.bf16.msra.mxu0 %v1486_v16  ;;  %p1530_p9 = pnand %p1529_p8, %p1523_p5 }
  0x1c   :  { %1313 = vmatmul.mubr.msk.bf16.gmra.mxu1 %vm58_vm2, %v57_v13  ;;  %1362 = vmatprep.subr.bf16.mxu0 %v1549_v0 }
  0x1d   :  { %1318 = vmatprep.mubr.msk.bf16.mxu1 %vm1550_vm0, %v1549_v0 }
  0x24   :  { %1319 = vmatmul.mubr.msk.bf16.vlgmr.msra.gmra.mxu1 %vm58_vm2, %v55_v9 }
  0x25   :  { %1322 = vmatprep.mubr.msk.bf16.mxu1 %vm1550_vm0, %v1549_v0  ;;  %1347 = vmatpush3.bf16.msra.mxu1 %v1485_v15 }
  0x26   :  { %1348 = vmatprep.subr.bf16.mxu1 %v1549_v0 }
  0x29   :  { %1349 = vmatpush3.bf16.msra.mxu1 %v1487_v17 }
  0x2a   :  { %1378 = vmatprep.subr.bf16.mxu1 %v1549_v0 }
  0x2c   :  { %1323 = vmatmul.mubr.msk.bf16.gmra.mxu1 %vm58_vm2, %v56_v10 }
  0x2d   :  { %1326 = vmatprep.mubr.msk.bf16.mxu1 %vm1550_vm0, %v1549_v0 }
  0x34   :  { %1327 = vmatmul.mubr.msk.bf16.gmra.mxu1 %vm58_vm2, %v57_v13 }
  0x35   :  { %1350 = vmatprep.mubr.msk.bf16.mxu1 %vm1550_vm0, %v1549_v0 }
  0xd4   :  { %v106_v18 = vpop.f32.mrf.mxu0  ;;  %v114_v19 = vpop.f32.mrf.mxu1 }
  0xd5   :  { %v189_v30 = vrot.slane %v106_v18, 7  ;;  %v191_v44 = vrot.slane %v114_v19, 7  ;;  %v1488_v18 = vld [vmem:[#allocation2 + $0x28] sm:$0xff]   ;;  %v1490_v19 = vld [vmem:[#allocation2 + $0x38] sm:$0xff]  }
  0xd6   :  { %v1306_v20 = vpop.f32.mrf.mxu0  ;;  %v1310_v21 = vpop.f32.mrf.mxu1 }
  0xd7   :  { %v1489_v20 = vld [vmem:[#allocation2 + $0x20] sm:$0xff]   ;;  %v1491_v21 = vld [vmem:[#allocation2 + $0x30] sm:$0xff]  }
  0xd8   :  { %v109_v22 = vpop.f32.mrf.mxu0  ;;  %v117_v23 = vpop.f32.mrf.mxu1 }
  0xd9   :  { %v190_v37 = vrot.slane %v109_v22, 7  ;;  %v192_v47 = vrot.slane %v117_v23, 7 }
  0xda   :  { %v1311_v24 = vpop.f32.mrf.mxu1  ;;  %v1307_v25 = vpop.f32.mrf.mxu0 }
  0xdb   :  { %v200_v41 = vsel %vm195_vm3, %v189_v30, %v190_v37  ;;  %v199_v49 = vsel %vm195_vm3, %v190_v37, %v191_v44  ;;  %v198_v58 = vsel %vm195_vm3, %v191_v44, %v192_v47 }
  0xdc   :  { %v122_v27 = vpop.f32.mrf.mxu1 }
  0xdd   :  { %v193_v59 = vrot.slane %v122_v27, 7 }
  0xde   :  { %v1314_v28 = vpop.f32.mrf.mxu1 }
  0xdf   :  { %v197_v3 = vsel %vm195_vm3, %v192_v47, %v193_v59 }
  0xe0   :  { %v125_v31 = vpop.f32.mrf.mxu1 }
  0xe1   :  { %v194_v32 = vrot.slane %v125_v31, 7 }
  0xe2   :  { %v1315_v33 = vpop.f32.mrf.mxu1 }
  0xe3   :  { %v201_v34 = vsel %vm195_vm3, %v194_v32, %v189_v30  ;;  %v196_v9 = vsel %vm195_vm3, %v193_v59, %v194_v32 }
  0xe4   :  { %v166_v35 = vpop.f32.mrf.mxu1 }
  0xe5   :  { %v202_v36 = vadd.f32 %v201_v34, %v166_v35 }
  0xe6   :  { %v1320_v39 = vpop.f32.mrf.mxu1 }
  0xe7   :  { %v214_v42 = vadd.f32 %v1198_v38, %v202_v36 }
  0xe8   :  { %v169_v40 = vpop.f32.mrf.mxu1 }
  0xe9   :  { %v203_v43 = vadd.f32 %v200_v41, %v169_v40  ;;  %v223_v50 = vmax.f32 %v214_v42, 0.0 }
  0xea   :  { %v1321_v45 = vpop.f32.mrf.mxu1 }
  0xeb   :  { %v215_v46 = vadd.f32 %v1198_v38, %v203_v43 }
  0xec   :  { %v174_v48 = vpop.f32.mrf.mxu1 }
  0xed   :  { %v224_v51 = vmax.f32 %v215_v46, 0.0  ;;  %v204_v52 = vadd.f32 %v199_v49, %v174_v48 }
  0xee   :  { %v1324_v53 = vpop.f32.mrf.mxu1 }
  0xef   :  { %v250_v54 = vpack.c.bf16 %v224_v51, %v223_v50  ;;  %v216_v56 = vadd.f32 %v1198_v38, %v204_v52  ;;  %v1209_v51 = vld [vmem:[%s1847_s4] ss:$0 sm:$0xff] }
  0xf0   :  { %v177_v57 = vpop.f32.mrf.mxu1 }
  0xf1   :  { %v205_v60 = vadd.f32 %v198_v58, %v177_v57  ;;  %1335 = vmatmul.mubr.msk.bf16.vlgmr.msra.gmra.mxu0 %vm265_vm4, %v250_v54  ;;  %1351 = vmatmul.mubr.msk.bf16.vlgmr.msra.gmra.mxu1 %vm265_vm4, %v250_v54  ;;  %v225_v61 = vmax.f32 %v216_v56, 0.0 }
  0xf2   :  { %v1325_v62 = vpop.f32.mrf.mxu1  ;;  %1338 = vmatprep.mubr.msk.bf16.mxu0 %vm1550_vm0, %v1549_v0  ;;  %1354 = vmatprep.mubr.msk.bf16.mxu1 %vm1550_vm0, %v1549_v0 }
  0xf3   :  { %v217_v63 = vadd.f32 %v1198_v38, %v205_v60  ;;  %v237_v4 = vsel %vm222_vm5, %v225_v61, 0.0  ;;  %1363 = vmatpush3.bf16.msra.mxu0 %v1488_v18  ;;  %1379 = vmatpush3.bf16.msra.mxu1 %v1490_v19 }
  0xf4   :  { %v182_v1 = vpop.f32.mrf.mxu1  ;;  %1364 = vmatprep.subr.bf16.mxu0 %v1549_v0  ;;  %1380 = vmatprep.subr.bf16.mxu1 %v1549_v0 }
  0xf5   :  { %v226_v2 = vmax.f32 %v217_v63, 0.0  ;;  %v206_v5 = vadd.f32 %v197_v3, %v182_v1 }
  0xf6   :  { %v1328_v6 = vpop.f32.mrf.mxu1 }
  0xf7   :  { %v251_v7 = vpack.c.bf16 %v226_v2, %v237_v4  ;;  %v218_v11 = vadd.f32 %v1198_v38, %v206_v5  ;;  %1365 = vmatpush3.bf16.msra.mxu0 %v1489_v20  ;;  %1381 = vmatpush3.bf16.msra.mxu1 %v1491_v21  ;;  %v1492_v21 = vld [vmem:[#allocation2 + $0x48] sm:$0xff]  }
  0xf8   :  { %v185_v8 = vpop.f32.mrf.mxu1  ;;  %1394 = vmatprep.subr.bf16.mxu0 %v1549_v0  ;;  %1410 = vmatprep.subr.bf16.mxu1 %v1549_v0 }
  0xf9   :  { %v207_v10 = vadd.f32 %v196_v9, %v185_v8  ;;  %1339 = vmatmul.mubr.msk.bf16.gmra.mxu0 %vm265_vm4, %v251_v7  ;;  %1355 = vmatmul.mubr.msk.bf16.gmra.mxu1 %vm265_vm4, %v251_v7  ;;  %v227_v15 = vmax.f32 %v218_v11, 0.0 }
  0xfa   :  { %v1329_v12 = vpop.f32.mrf.mxu1  ;;  %1342 = vmatprep.mubr.msk.bf16.mxu0 %vm1550_vm0, %v1549_v0  ;;  %1358 = vmatprep.mubr.msk.bf16.mxu1 %vm1550_vm0, %v1549_v0 }
  0xfb   :  { %v219_v13 = vadd.f32 %v1198_v38, %v207_v10 }
  0xfd   :  { %v228_v14 = vmax.f32 %v219_v13, 0.0 }
  0xff   :  { %v240_v16 = vsel %vm222_vm5, %v228_v14, 0.0 }
 0x100   :  { %v252_v17 = vpack.c.bf16 %v240_v16, %v227_v15 }
 0x102   :  { %1343 = vmatmul.mubr.msk.bf16.gmra.mxu0 %vm265_vm4, %v252_v17  ;;  %1359 = vmatmul.mubr.msk.bf16.gmra.mxu1 %vm265_vm4, %v252_v17 }
 0x103   :  { %1366 = vmatprep.mubr.msk.bf16.mxu0 %vm1550_vm0, %v1549_v0  ;;  %1382 = vmatprep.mubr.msk.bf16.mxu1 %vm1550_vm0, %v1549_v0 }
 0x1b1   :  { %v309_v22 = vpop.f32.mrf.mxu0  ;;  %v378_v23 = vpop.f32.mrf.mxu1 }
 0x1b2   :  { %v401_v40 = vrot.slane %v309_v22, 7  ;;  %v1494_v22 = vld [vmem:[#allocation2 + $0x58] sm:$0xff]  }
 0x1b3   :  { %v1336_v24 = vpop.f32.mrf.mxu0  ;;  %v1352_v25 = vpop.f32.mrf.mxu1 }
 0x1b4   :  { %v1495_v24 = vld [vmem:[#allocation2 + $0x50] sm:$0xff]  }
 0x1b5   :  { %v312_v26 = vpop.f32.mrf.mxu0  ;;  %v381_v27 = vpop.f32.mrf.mxu1 }
 0x1b6   :  { %v402_v37 = vrot.slane %v312_v26, 7 }
 0x1b7   :  { %v1337_v28 = vpop.f32.mrf.mxu0  ;;  %v1353_v30 = vpop.f32.mrf.mxu1 }
 0x1b8   :  { %v411_v43 = vsel %vm195_vm3, %v401_v40, %v402_v37 }
 0x1b9   :  { %v317_v31 = vpop.f32.mrf.mxu0  ;;  %v386_v32 = vpop.f32.mrf.mxu1  ;;  %v414_v48 = vadd.f32 %v411_v43, %v381_v27 }
 0x1ba   :  { %v403_v44 = vrot.slane %v317_v31, 7 }
 0x1bb   :  { %v1340_v33 = vpop.f32.mrf.mxu0  ;;  %v1356_v34 = vpop.f32.mrf.mxu1  ;;  %v424_v59 = vadd.f32 %v1209_v51, %v414_v48 }
 0x1bc   :  { %v410_v53 = vsel %vm195_vm3, %v402_v37, %v403_v44 }
 0x1bd   :  { %v320_v35 = vpop.f32.mrf.mxu0  ;;  %v389_v36 = vpop.f32.mrf.mxu1  ;;  %v415_v61 = vadd.f32 %v410_v53, %v386_v32  ;;  %v433_v2 = vmax.f32 %v424_v59, 0.0 }
 0x1be   :  { %v404_v47 = vrot.slane %v320_v35, 7 }
 0x1bf   :  { %v1341_v38 = vpop.f32.mrf.mxu0  ;;  %v1357_v39 = vpop.f32.mrf.mxu1  ;;  %v425_v5 = vadd.f32 %v1209_v51, %v415_v61 }
 0x1c0   :  { %v409_v57 = vsel %vm195_vm3, %v403_v44, %v404_v47 }
 0x1c1   :  { %v416_v62 = vadd.f32 %v409_v57, %v389_v36  ;;  %v434_v9 = vmax.f32 %v425_v5, 0.0 }
 0x1c2   :  { %v325_v41 = vpop.f32.mrf.mxu0  ;;  %v394_v42 = vpop.f32.mrf.mxu1 }
 0x1c3   :  { %v405_v63 = vrot.slane %v325_v41, 7  ;;  %v426_v6 = vadd.f32 %v1209_v51, %v416_v62  ;;  %v446_v14 = vsel %vm431_vm6, %v434_v9, 0.0 }
 0x1c4   :  { %v1344_v45 = vpop.f32.mrf.mxu0  ;;  %v1360_v46 = vpop.f32.mrf.mxu1 }
 0x1c5   :  { %v408_v10 = vsel %vm195_vm3, %v404_v47, %v405_v63  ;;  %v435_v11 = vmax.f32 %v426_v6, 0.0 }
 0x1c6   :  { %v328_v49 = vpop.f32.mrf.mxu0  ;;  %v397_v50 = vpop.f32.mrf.mxu1  ;;  %v417_v13 = vadd.f32 %v408_v10, %v394_v42 }
 0x1c7   :  { %v406_v52 = vrot.slane %v328_v49, 7  ;;  %v461_v15 = vpack.c.bf16 %v435_v11, %v446_v14 }
 0x1c8   :  { %v1345_v54 = vpop.f32.mrf.mxu0  ;;  %v1361_v56 = vpop.f32.mrf.mxu1  ;;  %v427_v17 = vadd.f32 %v1209_v51, %v417_v13 }
 0x1c9   :  { %v412_v58 = vsel %vm195_vm3, %v406_v52, %v401_v40  ;;  %v407_v4 = vsel %vm195_vm3, %v405_v63, %v406_v52  ;;  %v1220_v54 = vld [vmem:[%s1847_s4 + $0x1] ss:$0 sm:$0xff] }
 0x1ca   :  { %v413_v60 = vadd.f32 %v412_v58, %v378_v23  ;;  %v418_v8 = vadd.f32 %v407_v4, %v397_v50  ;;  %v436_v19 = vmax.f32 %v427_v17, 0.0  ;;  %v1493_v23 = vld [vmem:[#allocation2 + $0x40] sm:$0xff]  }
 0x1cc   :  { %v423_v1 = vadd.f32 %v1209_v51, %v413_v60  ;;  %v428_v12 = vadd.f32 %v1209_v51, %v418_v8 }
 0x1ce   :  { %v432_v3 = vmax.f32 %v423_v1, 0.0  ;;  %v437_v16 = vmax.f32 %v428_v12, 0.0 }
 0x1d0   :  { %v460_v7 = vpack.c.bf16 %v433_v2, %v432_v3  ;;  %v449_v18 = vsel %vm431_vm6, %v437_v16, 0.0 }
 0x1d1   :  { %v462_v20 = vpack.c.bf16 %v449_v18, %v436_v19 }
 0x1d2   :  { %1367 = vmatmul.mubr.msk.bf16.vlgmr.msra.gmra.mxu0 %vm265_vm4, %v460_v7  ;;  %1383 = vmatmul.mubr.msk.bf16.vlgmr.msra.gmra.mxu1 %vm265_vm4, %v460_v7 }
 0x1d3   :  { %1370 = vmatprep.mubr.msk.bf16.mxu0 %vm1550_vm0, %v1549_v0  ;;  %1386 = vmatprep.mubr.msk.bf16.mxu1 %vm1550_vm0, %v1549_v0 }
 0x1d4   :  { %1395 = vmatpush3.bf16.msra.mxu0 %v1492_v21  ;;  %1411 = vmatpush3.bf16.msra.mxu1 %v1494_v22 }
 0x1d5   :  { %1396 = vmatprep.subr.bf16.mxu0 %v1549_v0  ;;  %1412 = vmatprep.subr.bf16.mxu1 %v1549_v0 }
 0x1d8   :  { %1397 = vmatpush3.bf16.msra.mxu0 %v1493_v23  ;;  %1413 = vmatpush3.bf16.msra.mxu1 %v1495_v24  ;;  %v1496_v24 = vld [vmem:[#allocation2 + $0x68] sm:$0xff]  }
 0x1d9   :  { %1426 = vmatprep.subr.bf16.mxu0 %v1549_v0  ;;  %1442 = vmatprep.subr.bf16.mxu1 %v1549_v0 }
 0x1da   :  { %1371 = vmatmul.mubr.msk.bf16.gmra.mxu0 %vm265_vm4, %v461_v15  ;;  %1387 = vmatmul.mubr.msk.bf16.gmra.mxu1 %vm265_vm4, %v461_v15 }
 0x1db   :  { %1374 = vmatprep.mubr.msk.bf16.mxu0 %vm1550_vm0, %v1549_v0  ;;  %1390 = vmatprep.mubr.msk.bf16.mxu1 %vm1550_vm0, %v1549_v0 }
 0x1e2   :  { %1375 = vmatmul.mubr.msk.bf16.gmra.mxu0 %vm265_vm4, %v462_v20  ;;  %1391 = vmatmul.mubr.msk.bf16.gmra.mxu1 %vm265_vm4, %v462_v20 }
 0x1e3   :  { %1398 = vmatprep.mubr.msk.bf16.mxu0 %vm1550_vm0, %v1549_v0  ;;  %1414 = vmatprep.mubr.msk.bf16.mxu1 %vm1550_vm0, %v1549_v0 }
 0x292   :  { %v518_v25 = vpop.f32.mrf.mxu0  ;;  %v587_v26 = vpop.f32.mrf.mxu1 }
 0x293   :  { %v610_v43 = vrot.slane %v518_v25, 7  ;;  %v1498_v25 = vld [vmem:[#allocation2 + $0x78] sm:$0xff]  }
 0x294   :  { %v1368_v27 = vpop.f32.mrf.mxu0  ;;  %v1384_v28 = vpop.f32.mrf.mxu1 }
 0x295   :  { %v1499_v27 = vld [vmem:[#allocation2 + $0x70] sm:$0xff]  }
 0x296   :  { %v521_v30 = vpop.f32.mrf.mxu0  ;;  %v590_v31 = vpop.f32.mrf.mxu1 }
 0x297   :  { %v611_v40 = vrot.slane %v521_v30, 7 }
 0x298   :  { %v1369_v32 = vpop.f32.mrf.mxu0  ;;  %v1385_v33 = vpop.f32.mrf.mxu1 }
 0x299   :  { %v620_v46 = vsel %vm195_vm3, %v610_v43, %v611_v40 }
 0x29a   :  { %v526_v34 = vpop.f32.mrf.mxu0  ;;  %v595_v35 = vpop.f32.mrf.mxu1  ;;  %v623_v51 = vadd.f32 %v620_v46, %v590_v31 }
 0x29b   :  { %v612_v47 = vrot.slane %v526_v34, 7 }
 0x29c   :  { %v1372_v36 = vpop.f32.mrf.mxu0  ;;  %v1388_v37 = vpop.f32.mrf.mxu1  ;;  %v633_v62 = vadd.f32 %v1220_v54, %v623_v51 }
 0x29d   :  { %v619_v57 = vsel %vm195_vm3, %v611_v40, %v612_v47 }
 0x29e   :  { %v529_v38 = vpop.f32.mrf.mxu0  ;;  %v598_v39 = vpop.f32.mrf.mxu1  ;;  %v624_v1 = vadd.f32 %v619_v57, %v595_v35  ;;  %v642_v5 = vmax.f32 %v633_v62, 0.0 }
 0x29f   :  { %v613_v50 = vrot.slane %v529_v38, 7 }
 0x2a0   :  { %v1373_v41 = vpop.f32.mrf.mxu0  ;;  %v1389_v42 = vpop.f32.mrf.mxu1  ;;  %v634_v8 = vadd.f32 %v1220_v54, %v624_v1 }
 0x2a1   :  { %v618_v60 = vsel %vm195_vm3, %v612_v47, %v613_v50 }
 0x2a2   :  { %v534_v44 = vpop.f32.mrf.mxu0  ;;  %v603_v45 = vpop.f32.mrf.mxu1  ;;  %v625_v2 = vadd.f32 %v618_v60, %v598_v39  ;;  %v643_v12 = vmax.f32 %v634_v8, 0.0 }
 0x2a3   :  { %v614_v3 = vrot.slane %v534_v44, 7 }
 0x2a4   :  { %v1376_v48 = vpop.f32.mrf.mxu0  ;;  %v1392_v49 = vpop.f32.mrf.mxu1  ;;  %v635_v9 = vadd.f32 %v1220_v54, %v625_v2  ;;  %v655_v17 = vsel %vm640_vm7, %v643_v12, 0.0 }
 0x2a5   :  { %v617_v13 = vsel %vm195_vm3, %v613_v50, %v614_v3 }
 0x2a6   :  { %v537_v52 = vpop.f32.mrf.mxu0  ;;  %v606_v53 = vpop.f32.mrf.mxu1  ;;  %v644_v14 = vmax.f32 %v635_v9, 0.0  ;;  %v626_v16 = vadd.f32 %v617_v13, %v603_v45 }
 0x2a7   :  { %v615_v56 = vrot.slane %v537_v52, 7 }
 0x2a8   :  { %v1377_v58 = vpop.f32.mrf.mxu0  ;;  %v1393_v59 = vpop.f32.mrf.mxu1  ;;  %v670_v18 = vpack.c.bf16 %v644_v14, %v655_v17  ;;  %v636_v20 = vadd.f32 %v1220_v54, %v626_v16 }
 0x2a9   :  { %v621_v61 = vsel %vm195_vm3, %v615_v56, %v610_v43  ;;  %v616_v7 = vsel %vm195_vm3, %v614_v3, %v615_v56  ;;  %v1231_v58 = vld [vmem:[%s1847_s4 + $0x2] ss:$0 sm:$0xff] }
 0x2aa   :  { %v622_v63 = vadd.f32 %v621_v61, %v587_v26  ;;  %v627_v11 = vadd.f32 %v616_v7, %v606_v53  ;;  %v645_v22 = vmax.f32 %v636_v20, 0.0  ;;  %v1497_v26 = vld [vmem:[#allocation2 + $0x60] sm:$0xff]  }
 0x2ac   :  { %v632_v4 = vadd.f32 %v1220_v54, %v622_v63  ;;  %v637_v15 = vadd.f32 %v1220_v54, %v627_v11 }
 0x2ae   :  { %v641_v6 = vmax.f32 %v632_v4, 0.0  ;;  %v646_v19 = vmax.f32 %v637_v15, 0.0 }
 0x2b0   :  { %v669_v10 = vpack.c.bf16 %v642_v5, %v641_v6  ;;  %v658_v21 = vsel %vm640_vm7, %v646_v19, 0.0 }
 0x2b1   :  { %v671_v23 = vpack.c.bf16 %v658_v21, %v645_v22 }
 0x2b2   :  { %1399 = vmatmul.mubr.msk.bf16.vlgmr.msra.gmra.mxu0 %vm265_vm4, %v669_v10  ;;  %1415 = vmatmul.mubr.msk.bf16.vlgmr.msra.gmra.mxu1 %vm265_vm4, %v669_v10 }
 0x2b3   :  { %1402 = vmatprep.mubr.msk.bf16.mxu0 %vm1550_vm0, %v1549_v0  ;;  %1418 = vmatprep.mubr.msk.bf16.mxu1 %vm1550_vm0, %v1549_v0 }
 0x2b4   :  { %1427 = vmatpush3.bf16.msra.mxu0 %v1496_v24  ;;  %1443 = vmatpush3.bf16.msra.mxu1 %v1498_v25 }
 0x2b5   :  { %1428 = vmatprep.subr.bf16.mxu0 %v1549_v0  ;;  %1444 = vmatprep.subr.bf16.mxu1 %v1549_v0 }
 0x2b8   :  { %1429 = vmatpush3.bf16.msra.mxu0 %v1497_v26  ;;  %1445 = vmatpush3.bf16.msra.mxu1 %v1499_v27  ;;  %v1500_v27 = vld [vmem:[%s1848_s5 + $0x8] sm:$0xff]  }
 0x2b9   :  { %1458 = vmatprep.subr.bf16.mxu0 %v1549_v0 }
 0x2ba   :  { %1403 = vmatmul.mubr.msk.bf16.gmra.mxu0 %vm265_vm4, %v670_v18  ;;  %1419 = vmatmul.mubr.msk.bf16.gmra.mxu1 %vm265_vm4, %v670_v18 }
 0x2bb   :  { %1406 = vmatprep.mubr.msk.bf16.mxu0 %vm1550_vm0, %v1549_v0  ;;  %1422 = vmatprep.mubr.msk.bf16.mxu1 %vm1550_vm0, %v1549_v0 }
 0x2c2   :  { %1407 = vmatmul.mubr.msk.bf16.gmra.mxu0 %vm265_vm4, %v671_v23  ;;  %1423 = vmatmul.mubr.msk.bf16.gmra.mxu1 %vm265_vm4, %v671_v23 }
 0x2c3   :  { %1430 = vmatprep.mubr.msk.bf16.mxu0 %vm1550_vm0, %v1549_v0  ;;  %1446 = vmatprep.mubr.msk.bf16.mxu1 %vm1550_vm0, %v1549_v0 }
 0x372   :  { %v727_v28 = vpop.f32.mrf.mxu0  ;;  %v796_v30 = vpop.f32.mrf.mxu1 }
 0x373   :  { %v819_v46 = vrot.slane %v727_v28, 7  ;;  %v1501_v28 = vld [vmem:[%s1848_s5] sm:$0xff]  }
 0x374   :  { %v1400_v31 = vpop.f32.mrf.mxu0  ;;  %v1416_v32 = vpop.f32.mrf.mxu1 }
 0x376   :  { %v730_v33 = vpop.f32.mrf.mxu0  ;;  %v799_v34 = vpop.f32.mrf.mxu1 }
 0x377   :  { %v820_v43 = vrot.slane %v730_v33, 7 }
 0x378   :  { %v1401_v35 = vpop.f32.mrf.mxu0  ;;  %v1417_v36 = vpop.f32.mrf.mxu1 }
 0x379   :  { %v829_v49 = vsel %vm195_vm3, %v819_v46, %v820_v43 }
 0x37a   :  { %v735_v37 = vpop.f32.mrf.mxu0  ;;  %v804_v38 = vpop.f32.mrf.mxu1  ;;  %v832_v54 = vadd.f32 %v829_v49, %v799_v34 }
 0x37b   :  { %v821_v50 = vrot.slane %v735_v37, 7 }
 0x37c   :  { %v1404_v39 = vpop.f32.mrf.mxu0  ;;  %v1420_v40 = vpop.f32.mrf.mxu1  ;;  %v842_v2 = vadd.f32 %v1231_v58, %v832_v54 }
 0x37d   :  { %v828_v60 = vsel %vm195_vm3, %v820_v43, %v821_v50 }
 0x37e   :  { %v738_v41 = vpop.f32.mrf.mxu0  ;;  %v807_v42 = vpop.f32.mrf.mxu1  ;;  %v833_v4 = vadd.f32 %v828_v60, %v804_v38  ;;  %v851_v8 = vmax.f32 %v842_v2, 0.0 }
 0x37f   :  { %v822_v53 = vrot.slane %v738_v41, 7 }
 0x380   :  { %v1405_v44 = vpop.f32.mrf.mxu0  ;;  %v1421_v45 = vpop.f32.mrf.mxu1  ;;  %v843_v11 = vadd.f32 %v1231_v58, %v833_v4 }
 0x381   :  { %v827_v63 = vsel %vm195_vm3, %v821_v50, %v822_v53 }
 0x382   :  { %v743_v47 = vpop.f32.mrf.mxu0  ;;  %v812_v48 = vpop.f32.mrf.mxu1  ;;  %v834_v5 = vadd.f32 %v827_v63, %v807_v42  ;;  %v852_v15 = vmax.f32 %v843_v11, 0.0 }
 0x383   :  { %v823_v6 = vrot.slane %v743_v47, 7 }
 0x384   :  { %v1408_v51 = vpop.f32.mrf.mxu0  ;;  %v1424_v52 = vpop.f32.mrf.mxu1  ;;  %v844_v12 = vadd.f32 %v1231_v58, %v834_v5  ;;  %v864_v20 = vsel %vm849_vm8, %v852_v15, 0.0 }
 0x385   :  { %v826_v16 = vsel %vm195_vm3, %v822_v53, %v823_v6 }
 0x386   :  { %v746_v56 = vpop.f32.mrf.mxu0  ;;  %v815_v57 = vpop.f32.mrf.mxu1  ;;  %v853_v17 = vmax.f32 %v844_v12, 0.0  ;;  %v835_v19 = vadd.f32 %v826_v16, %v812_v48 }
 0x387   :  { %v824_v59 = vrot.slane %v746_v56, 7 }
 0x388   :  { %v1409_v61 = vpop.f32.mrf.mxu0  ;;  %v1425_v62 = vpop.f32.mrf.mxu1  ;;  %v879_v21 = vpack.c.bf16 %v853_v17, %v864_v20  ;;  %v845_v23 = vadd.f32 %v1231_v58, %v835_v19 }
 0x389   :  { %v830_v1 = vsel %vm195_vm3, %v824_v59, %v819_v46  ;;  %v825_v10 = vsel %vm195_vm3, %v823_v6, %v824_v59  ;;  %v1242_v59 = vld [vmem:[%s1847_s4 + $0x3] ss:$0 sm:$0xff] }
 0x38a   :  { %v831_v3 = vadd.f32 %v830_v1, %v796_v30  ;;  %v836_v14 = vadd.f32 %v825_v10, %v815_v57  ;;  %v854_v25 = vmax.f32 %v845_v23, 0.0 }
 0x38c   :  { %v841_v7 = vadd.f32 %v1231_v58, %v831_v3  ;;  %v846_v18 = vadd.f32 %v1231_v58, %v836_v14 }
 0x38e   :  { %v850_v9 = vmax.f32 %v841_v7, 0.0  ;;  %v855_v22 = vmax.f32 %v846_v18, 0.0 }
 0x390   :  { %v878_v13 = vpack.c.bf16 %v851_v8, %v850_v9  ;;  %v867_v24 = vsel %vm849_vm8, %v855_v22, 0.0 }
 0x391   :  { %v880_v26 = vpack.c.bf16 %v867_v24, %v854_v25 }
 0x392   :  { %1431 = vmatmul.mubr.msk.bf16.vlgmr.msra.gmra.mxu0 %vm265_vm4, %v878_v13  ;;  %1447 = vmatmul.mubr.msk.bf16.vlgmr.msra.gmra.mxu1 %vm265_vm4, %v878_v13 }
 0x393   :  { %1434 = vmatprep.mubr.msk.bf16.mxu0 %vm1550_vm0, %v1549_v0  ;;  %1450 = vmatprep.mubr.msk.bf16.mxu1 %vm1550_vm0, %v1549_v0 }
 0x394   :  { %1459 = vmatpush3.bf16.msra.mxu0 %v1500_v27 }
 0x395   :  { %1460 = vmatprep.subr.bf16.mxu0 %v1549_v0 }
 0x398   :  { %1461 = vmatpush3.bf16.msra.mxu0 %v1501_v28 }
 0x39a   :  { %1435 = vmatmul.mubr.msk.bf16.gmra.mxu0 %vm265_vm4, %v879_v21  ;;  %1451 = vmatmul.mubr.msk.bf16.gmra.mxu1 %vm265_vm4, %v879_v21 }
 0x39b   :  { %1438 = vmatprep.mubr.msk.bf16.mxu0 %vm1550_vm0, %v1549_v0  ;;  %1454 = vmatprep.mubr.msk.bf16.mxu1 %vm1550_vm0, %v1549_v0 }
 0x3a2   :  { %1439 = vmatmul.mubr.msk.bf16.gmra.mxu0 %vm265_vm4, %v880_v26  ;;  %1455 = vmatmul.mubr.msk.bf16.gmra.mxu1 %vm265_vm4, %v880_v26 }
 0x3a3   :  { %1462 = vmatprep.mubr.msk.bf16.mxu0 %vm1550_vm0, %v1549_v0 }
 0x452   :  { %v936_v30 = vpop.f32.mrf.mxu0  ;;  %v1005_v31 = vpop.f32.mrf.mxu1 }
 0x453   :  { %v1028_v47 = vrot.slane %v936_v30, 7 }
 0x454   :  { %v1432_v32 = vpop.f32.mrf.mxu0  ;;  %v1448_v33 = vpop.f32.mrf.mxu1 }
 0x456   :  { %v939_v34 = vpop.f32.mrf.mxu0  ;;  %v1008_v35 = vpop.f32.mrf.mxu1 }
 0x457   :  { %v1029_v44 = vrot.slane %v939_v34, 7 }
 0x458   :  { %v1433_v36 = vpop.f32.mrf.mxu0  ;;  %v1449_v37 = vpop.f32.mrf.mxu1 }
 0x459   :  { %v1038_v50 = vsel %vm195_vm3, %v1028_v47, %v1029_v44 }
 0x45a   :  { %v944_v38 = vpop.f32.mrf.mxu0  ;;  %v1013_v39 = vpop.f32.mrf.mxu1  ;;  %v1041_v56 = vadd.f32 %v1038_v50, %v1008_v35 }
 0x45b   :  { %v1030_v51 = vrot.slane %v944_v38, 7 }
 0x45c   :  { %v1436_v40 = vpop.f32.mrf.mxu0  ;;  %v1452_v41 = vpop.f32.mrf.mxu1  ;;  %v1051_v3 = vadd.f32 %v1242_v59, %v1041_v56 }
 0x45d   :  { %v1037_v61 = vsel %vm195_vm3, %v1029_v44, %v1030_v51 }
 0x45e   :  { %v947_v42 = vpop.f32.mrf.mxu0  ;;  %v1016_v43 = vpop.f32.mrf.mxu1  ;;  %v1042_v5 = vadd.f32 %v1037_v61, %v1013_v39  ;;  %v1060_v9 = vmax.f32 %v1051_v3, 0.0 }
 0x45f   :  { %v1031_v54 = vrot.slane %v947_v42, 7 }
 0x460   :  { %v1437_v45 = vpop.f32.mrf.mxu0  ;;  %v1453_v46 = vpop.f32.mrf.mxu1  ;;  %v1052_v12 = vadd.f32 %v1242_v59, %v1042_v5 }
 0x461   :  { %v1036_v1 = vsel %vm195_vm3, %v1030_v51, %v1031_v54 }
 0x462   :  { %v952_v48 = vpop.f32.mrf.mxu0  ;;  %v1021_v49 = vpop.f32.mrf.mxu1  ;;  %v1043_v6 = vadd.f32 %v1036_v1, %v1016_v43  ;;  %v1061_v16 = vmax.f32 %v1052_v12, 0.0 }
 0x463   :  { %v1032_v7 = vrot.slane %v952_v48, 7 }
 0x464   :  { %v1440_v52 = vpop.f32.mrf.mxu0  ;;  %v1456_v53 = vpop.f32.mrf.mxu1  ;;  %v1053_v13 = vadd.f32 %v1242_v59, %v1043_v6  ;;  %v1073_v21 = vsel %vm1058_vm9, %v1061_v16, 0.0 }
 0x465   :  { %v1035_v17 = vsel %vm195_vm3, %v1031_v54, %v1032_v7 }
 0x466   :  { %v955_v57 = vpop.f32.mrf.mxu0  ;;  %v1024_v58 = vpop.f32.mrf.mxu1  ;;  %v1062_v18 = vmax.f32 %v1053_v13, 0.0  ;;  %v1044_v20 = vadd.f32 %v1035_v17, %v1021_v49 }
 0x467   :  { %v1033_v60 = vrot.slane %v955_v57, 7 }
 0x468   :  { %v1441_v62 = vpop.f32.mrf.mxu0  ;;  %v1457_v63 = vpop.f32.mrf.mxu1  ;;  %v1078_v22 = vpack.c.bf16 %v1062_v18, %v1073_v21  ;;  %v1054_v24 = vadd.f32 %v1242_v59, %v1044_v20 }
 0x469   :  { %v1039_v2 = vsel %vm195_vm3, %v1033_v60, %v1028_v47  ;;  %v1034_v11 = vsel %vm195_vm3, %v1032_v7, %v1033_v60 }
 0x46a   :  { %v1040_v4 = vadd.f32 %v1039_v2, %v1005_v31  ;;  %v1045_v15 = vadd.f32 %v1034_v11, %v1024_v58  ;;  %v1063_v29 = vmax.f32 %v1054_v24, 0.0 }
 0x46c   :  { %v1050_v8 = vadd.f32 %v1242_v59, %v1040_v4  ;;  %v1055_v19 = vadd.f32 %v1242_v59, %v1045_v15 }
 0x46e   :  { %v1059_v10 = vmax.f32 %v1050_v8, 0.0  ;;  %v1064_v23 = vmax.f32 %v1055_v19, 0.0 }
 0x470   :  { %v1077_v14 = vpack.c.bf16 %v1060_v9, %v1059_v10  ;;  %v1076_v25 = vsel %vm1058_vm9, %v1064_v23, 0.0 }
 0x471   :  { %v1079_v26 = vpack.c.bf16 %v1076_v25, %v1063_v29 }
 0x472   :  { %1463 = vmatmul.mubr.msk.bf16.vlgmr.msra.gmra.mxu0 %vm265_vm4, %v1077_v14 }
 0x473   :  { %1466 = vmatprep.mubr.msk.bf16.mxu0 %vm1550_vm0, %v1549_v0 }
 0x47a   :  { %1467 = vmatmul.mubr.msk.bf16.gmra.mxu0 %vm265_vm4, %v1078_v22 }
 0x47b   :  { %1470 = vmatprep.mubr.msk.bf16.mxu0 %vm1550_vm0, %v1549_v0 }
 0x482   :  { %1471 = vmatmul.mubr.msk.bf16.gmra.mxu0 %vm265_vm4, %v1079_v26 }
 0x532   :  { %v1146_v27 = vpop.f32.mrf.mxu0 }
 0x533   :  { %v1147_v28 = vadd.f32 %v1243_v55, %v1146_v27 }
 0x534   :  { %v1464_v30 = vpop.f32.mrf.mxu0 }
 0x535   :  { %1169 = vst [vmem:[#allocation5] sm:$0xff] %v1147_v28 }
 0x536   :  { %v1149_v31 = vpop.f32.mrf.mxu0 }
 0x537   :  { %v1150_v32 = vadd.f32 %v1243_v55, %v1149_v31 }
 0x538   :  { %v1465_v33 = vpop.f32.mrf.mxu0 }
 0x539   :  { %1170 = vst [vmem:[#allocation5 + $0x8] sm:$0xff] %v1150_v32 }
 0x53a   :  { %v1154_v34 = vpop.f32.mrf.mxu0 }
 0x53b   :  { %v1155_v35 = vadd.f32 %v1243_v55, %v1154_v34 }
 0x53c   :  { %v1468_v0 = vpop.f32.mrf.mxu0 }
 0x53d   :  { %1171 = vst [vmem:[#allocation5 + $0x10] sm:$0xff] %v1155_v35 }
 0x53e   :  { %v1157_v36 = vpop.f32.mrf.mxu0 }
 0x53f   :  { %v1158_v37 = vadd.f32 %v1243_v55, %v1157_v36 }
 0x540   :  { %v1469_v38 = vpop.f32.mrf.mxu0 }
 0x541   :  { %1172 = vst [vmem:[#allocation5 + $0x18] sm:$0xff] %v1158_v37 }
 0x542   :  { %v1162_v39 = vpop.f32.mrf.mxu0 }
 0x543   :  { %v1163_v40 = vadd.f32 %v1243_v55, %v1162_v39 }
 0x544   :  { %v1472_v41 = vpop.f32.mrf.mxu0 }
 0x545   :  { %1173 = vst [vmem:[#allocation5 + $0x20] sm:$0xff] %v1163_v40 }
 0x546   :  { %v1165_v42 = vpop.f32.mrf.mxu0 }
 0x547   :  { %v1166_v43 = vadd.f32 %v1243_v55, %v1165_v42 }
 0x548   :  { %v1473_v44 = vpop.f32.mrf.mxu0 }
 0x549   :  { %1174 = vst [vmem:[#allocation5 + $0x28] sm:$0xff] %v1166_v43 }
 0x54a   :  { %1533 = shalt.err (!%p1530_p9)
}
 0x54b   :  { %s1552_s12 = smov 128   ;;  %s1553_s13 = smov 8  }
 0x54c   :  { %1186 = dma.vmem_to_hbm [thread:$0]  %s1181_s6, 768, %s1850_s7, [#allocation4], %s1552_s12, %s1552_s12, %s1553_s13  }
 0x54d   :  { %1544 = dma.done.wait [#allocation4], 768  }
 0x54e   :  { %1545 = vsyncadd [#allocation4], 4294966528 }
 0x54f   :  { %1190 = vsyncpa [#allocation3], 1 }
 0x550   :  { %1191 = vsyncpa [#allocation4], 1 }

</bundles_post_ra>
